<compile_context>
chip_gen: v6e
topology: v6e:2x2x1
jax: 0.10.0
libtpu: 0.0.40
codegen_flags: <defaults>
</compile_context>

<pallas_src>
import functools

import jax
import jax.numpy as jnp
from jax.experimental import pallas as pl
from jax.experimental.pallas import tpu as pltpu


def _loss_kernel(y_ref, p_ref, out_ref, *, smoothing, num_valid):
    # y_ref: [TB, 1] int32 (VMEM), p_ref: [TB, K] logits (VMEM, native dtype),
    # out_ref: [1, 1] f32 (SMEM) -> this tile's partial loss.
    i = pl.program_id(0)

    p = p_ref[...].astype(jnp.float32)            # cast-on-load (halves HBM traffic for bf16)
    y = y_ref[...]                                 # [TB, 1] int32
    TB, K = p.shape

    # Numerically-stable log-softmax pieces (row reductions -> XLU, exp -> EUP).
    m = jnp.max(p, axis=1, keepdims=True)          # [TB, 1]
    z = p - m                                      # [TB, K]
    lse = jnp.log(jnp.sum(jnp.exp(z), axis=1, keepdims=True))   # [TB, 1]

    # Fused label-smoothing weights; since sum_j q_ij == 1:
    #   loss_i = sum_j q_ij * (z_ij - lse_i) = sum_j (w_ij * z_ij) - lse_i
    col = jax.lax.broadcasted_iota(jnp.int32, (TB, K), 1)
    base = jnp.float32(smoothing / K)
    w = jnp.where(col == y, base + jnp.float32(1.0 - smoothing), base)
    row_loss = jnp.sum(w * z, axis=1, keepdims=True) - lse       # [TB, 1]

    # Mask undefined rows of the (possibly partial) edge tile.  No cross-row op before this.
    row = jax.lax.broadcasted_iota(jnp.int32, (TB, 1), 0) + i * TB
    row_loss = jnp.where(row < num_valid, row_loss, 0.0)

    # Per-tile partial sum (no cross-tile accumulation -> safe under "parallel" semantics).
    out_ref[0, 0] = jnp.sum(row_loss)


def _choose_row_tile(B, K, itemsize):
    """Largest row tile whose accounted VMEM footprint stays under ~40 MiB
    (48 MiB limit minus headroom): double-buffered logits + ~3x f32 full-tile
    temporaries + double-buffered lane-padded (tb, 1) int32 label column."""
    budget = 40 * 1024 * 1024
    per_row = K * (2 * itemsize + 12) + 2 * 512
    tb = budget // max(1, per_row)
    tb = max(32, min(8192, (tb // 32) * 32))       # multiple of 32: dtype-proof sublane packing
    if B <= tb:
        return B                                   # full-extent block is always legal
    return tb


def loss_inception_v3(y, p, *, smoothing=0.1, rows_per_tile=None):
    """y: int array [B] of class indices; p: float array [B, K] of logits.
    Returns the scalar loss sum_i sum_j log_softmax(p)_ij * q_ij."""
    B, K = p.shape
    itemsize = jnp.dtype(p.dtype).itemsize
    tb = rows_per_tile if rows_per_tile is not None else _choose_row_tile(B, K, itemsize)
    tb = min(tb, B)
    n_tiles = pl.cdiv(B, tb)

    y2 = y.reshape(B, 1).astype(jnp.int32)         # no padding of logits or labels

    cost = pl.CostEstimate(
        flops=5 * B * K,
        transcendentals=B * K + B,
        bytes_accessed=B * K * itemsize + B * 4 + n_tiles * 4,
    )

    partials = pl.pallas_call(
        functools.partial(_loss_kernel, smoothing=float(smoothing), num_valid=B),
        out_shape=jax.ShapeDtypeStruct((n_tiles, 1), jnp.float32),
        grid_spec=pltpu.PrefetchScalarGridSpec(
            num_scalar_prefetch=0,
            grid=(n_tiles,),
            in_specs=[
                pl.BlockSpec((tb, 1), lambda i: (i, 0)),    # labels, tiled with the logits
                pl.BlockSpec((tb, K), lambda i: (i, 0)),    # logits (native dtype)
            ],
            out_specs=pl.BlockSpec((1, 1), lambda i: (i, 0), memory_space=pltpu.SMEM),
        ),
        compiler_params=pltpu.CompilerParams(
            dimension_semantics=("parallel",),              # per-tile partials -> both TCs on v7x
            vmem_limit_bytes=48 * 1024 * 1024,              # safe on v5e/v6e/v7x
        ),
        cost_estimate=cost,
    )(y2, p)

    return jnp.sum(partials)                        # tiny tree-sum of per-tile partials


def _reference(y, p, smoothing):
    # Pure-JAX reference mirroring the PyTorch forward.
    B, K = p.shape
    q = jnp.full((B, K), smoothing / K, dtype=jnp.float32)
    q = q.at[jnp.arange(B), y].add(1.0 - smoothing)
    logp = jax.nn.log_softmax(p.astype(jnp.float32), axis=1)
    return jnp.sum(logp * q)


if __name__ == "__main__":
    # Module config (deterministic, in-script): K classes, smoothing=0.1
    K = 5
    smoothing = 0.1
    B = 4

    key = jax.random.PRNGKey(0)
    k_p, k_y = jax.random.split(key)
    p = jax.random.normal(k_p, (B, K), dtype=jnp.float32)          # logits [B, K]
    y = jax.random.randint(k_y, (B,), 0, K, dtype=jnp.int32)       # labels [B]

    loss = jax.block_until_ready(loss_inception_v3(y, p, smoothing=smoothing))
    ref = jax.block_until_ready(_reference(y, p, smoothing))
    assert jnp.allclose(loss, ref, atol=1e-5, rtol=1e-5), (loss, ref)

    # Multi-tile + partial edge-block path (no padding; masked in-kernel), forced small tiles.
    B2, K2 = 777, 257
    p2 = jax.random.normal(jax.random.PRNGKey(1), (B2, K2), dtype=jnp.float32)
    y2 = jax.random.randint(jax.random.PRNGKey(2), (B2,), 0, K2, dtype=jnp.int32)
    loss2 = jax.block_until_ready(
        loss_inception_v3(y2, p2, smoothing=smoothing, rows_per_tile=256))
    ref2 = jax.block_until_ready(_reference(y2, p2, smoothing))
    assert jnp.allclose(loss2, ref2, atol=1e-3, rtol=1e-5), (loss2, ref2)

    # bf16 logits streamed in native dtype, cast to f32 on the VMEM tile.
    p3 = p2.astype(jnp.bfloat16)
    loss3 = jax.block_until_ready(
        loss_inception_v3(y2, p3, smoothing=smoothing, rows_per_tile=256))
    ref3 = jax.block_until_ready(_reference(y2, p3, smoothing))
    assert jnp.allclose(loss3, ref3, atol=5e-2, rtol=1e-4), (loss3, ref3)

    print("KERNEL_OK")
</pallas_src>

<mosaic_0001>
module attributes {stable_mosaic.version = 11 : i64} {
  func.func @_loss_kernel(%arg0: i32, %arg1: memref<4x1xi32, #tpu.memory_space<vmem>>, %arg2: memref<4x5xf32, #tpu.memory_space<vmem>>, %arg3: memref<1x1xf32, #tpu.memory_space<smem>>) attributes {dimension_semantics = [#tpu.dimension_semantics<parallel>], iteration_bounds = array<i64: 1>, scalar_prefetch = 0 : i64, scratch_operands = 0 : i64, tpu.core_type = #tpu.core_type<tc>, window_params = [{transform_indices = @transform_0, window_bounds = array<i64: 4, 1>}, {transform_indices = @transform_1, window_bounds = array<i64: 4, 5>}, {transform_indices = @transform_2, window_bounds = array<i64: 1, 1>}]} {
    %c0 = arith.constant 0 : index
    %c0_0 = arith.constant 0 : index
    %0 = vector.load %arg2[%c0, %c0_0] : memref<4x5xf32, #tpu.memory_space<vmem>>, vector<4x5xf32>
    %c0_1 = arith.constant 0 : index
    %c0_2 = arith.constant 0 : index
    %1 = vector.load %arg1[%c0_1, %c0_2] : memref<4x1xi32, #tpu.memory_space<vmem>>, vector<4x1xi32>
    %cst = arith.constant dense<0xFF800000> : vector<4xf32>
    %2 = vector.multi_reduction <maximumf>, %0, %cst [1] : vector<4x5xf32> to vector<4xf32>
    %3 = vector.shape_cast %2 : vector<4xf32> to vector<4x1xf32>
    %4 = vector.broadcast %3 : vector<4x1xf32> to vector<4x5xf32>
    %5 = arith.subf %0, %4 : vector<4x5xf32>
    %6 = math.exp %5 : vector<4x5xf32>
    %cst_3 = arith.constant dense<0.000000e+00> : vector<4xf32>
    %7 = vector.multi_reduction <add>, %6, %cst_3 [1] : vector<4x5xf32> to vector<4xf32>
    %8 = vector.shape_cast %7 : vector<4xf32> to vector<4x1xf32>
    %9 = math.log %8 : vector<4x1xf32>
    %10 = tpu.iota {dimensions = array<i32: 1>} : vector<4x5xi32>
    %11 = vector.broadcast %1 : vector<4x1xi32> to vector<4x5xi32>
    %12 = arith.cmpi eq, %10, %11 : vector<4x5xi32>
    %cst_4 = arith.constant 2.000000e-02 : f32
    %cst_5 = arith.constant 0.899999976 : f32
    %13 = arith.addf %cst_4, %cst_5 : f32
    %cst_6 = arith.constant 2.000000e-02 : f32
    %14 = vector.broadcast %13 : f32 to vector<4x5xf32>
    %15 = vector.broadcast %cst_6 : f32 to vector<4x5xf32>
    %16 = arith.select %12, %14, %15 : vector<4x5xi1>, vector<4x5xf32>
    %17 = arith.mulf %16, %5 : vector<4x5xf32>
    %cst_7 = arith.constant dense<0.000000e+00> : vector<4xf32>
    %18 = vector.multi_reduction <add>, %17, %cst_7 [1] : vector<4x5xf32> to vector<4xf32>
    %19 = vector.shape_cast %18 : vector<4xf32> to vector<4x1xf32>
    %20 = arith.subf %19, %9 : vector<4x1xf32>
    %21 = tpu.iota {dimensions = array<i32: 0>} : vector<4x1xi32>
    %c4_i32 = arith.constant 4 : i32
    %22 = arith.muli %arg0, %c4_i32 : i32
    %23 = vector.broadcast %22 : i32 to vector<4x1xi32>
    %24 = arith.addi %21, %23 : vector<4x1xi32>
    %c4_i32_8 = arith.constant 4 : i32
    %25 = vector.broadcast %c4_i32_8 : i32 to vector<4x1xi32>
    %26 = arith.cmpi slt, %24, %25 : vector<4x1xi32>
    %cst_9 = arith.constant 0.000000e+00 : f32
    %27 = vector.broadcast %cst_9 : f32 to vector<4x1xf32>
    %28 = arith.select %26, %20, %27 : vector<4x1xi1>, vector<4x1xf32>
    %29 = vector.shape_cast %28 : vector<4x1xf32> to vector<1x4x1xf32>
    %cst_10 = arith.constant dense<0.000000e+00> : vector<1xf32>
    %30 = vector.multi_reduction <add>, %29, %cst_10 [1, 2] : vector<1x4x1xf32> to vector<1xf32>
    %31 = vector.shape_cast %30 : vector<1xf32> to vector<1x1x1xf32>
    %32 = vector.extract %31[0, 0, 0] : f32 from vector<1x1x1xf32>
    %c0_11 = arith.constant 0 : index
    %c0_12 = arith.constant 0 : index
    %33 = memref.load %arg3[%c0_11, %c0_12] : memref<1x1xf32, #tpu.memory_space<smem>>
    memref.store %32, %arg3[%c0_11, %c0_12] : memref<1x1xf32, #tpu.memory_space<smem>>
    return
  }
  func.func @transform_0(%arg0: i32) -> (i32, i32) {
    %c0_i32 = arith.constant 0 : i32
    %c0_i32_0 = arith.constant 0 : i32
    return %arg0, %c0_i32 : i32, i32
  }
  func.func @transform_1(%arg0: i32) -> (i32, i32) {
    %c0_i32 = arith.constant 0 : i32
    %c0_i32_0 = arith.constant 0 : i32
    return %arg0, %c0_i32 : i32, i32
  }
  func.func @transform_2(%arg0: i32) -> (i32, i32) {
    %c0_i32 = arith.constant 0 : i32
    %c0_i32_0 = arith.constant 0 : i32
    return %arg0, %c0_i32 : i32, i32
  }
}

</mosaic_0001>

<bundles_post_ra>
// kernel: tpu_custom_call.1
= control target key start
LH: loop header
LB: loop body
LE: loop exit
PB: predicated region body
PF: predicated region fallthrough
CT: control target
= control target key end

     0   :  { %vm14_vm0 = vcmask 35840   ;;  %v91_v2 = vmov 0   ;;  %s121_s0 = inlined_call_operand.vmem [shape: s32[4,1], index: 0, kind: input, shape index: {}]   ;;  %s122_s1 = inlined_call_operand.vmem [shape: f32[4,5], index: 1, kind: input, shape index: {}]   ;;  %s123_s2 = inlined_call_operand.hbm [shape: f32[1,1], index: 2, kind: output, shape index: {}]  }
   0x1   :  { %v12_v0 = vld [vmem:[%s122_s1] sm:$0xf]  ;;  %76 = vset.pattern.permute.xlu0 %v91_v2 }
   0x2   :  { %v15_v1 = vsel %vm14_vm0, %v12_v0, -inf }
   0x3   :  { %7 = vsyncpa [#allocation3], 0  ;;  %16 = vmax.xlane.f32.xlu0 %v15_v1  ;;  %v13_v3 = vld [vmem:[%s121_s0] sm:$0xf]  ;;  %v26_v7 = vlaneseq  ;;  %v92_v10 = vmov 0.02  }
   0x4   :  { %vm45_vm3 = vcmask 3072   ;;  %s93_s1 = smov [#allocation2]  }
   0x5   :  { %v27_v8 = vand.u32 127, %v26_v7  ;;  %v39_v17 = vshrl.u32 %v26_v7, 7 }
   0x7   :  { %vm43_vm2 = vcmp.lt.s32.totalorder %v39_v17, 4 }
  0x19   :  { %29 = vperm.xlu0 %76, %v13_v3  }
  0x8c   :  { %v17_v4 = vpop.xlane.xlu0 %16 }
  0x8d   :  { %v18_v5 = vsub.f32 %v12_v0, %v17_v4 }
  0x8f   :  { %v19_v6 = vmul.f32 1.442695, %v18_v5 }
  0x91   :  { %77 = vpow2.f32 %v19_v6 }
  0x94   :  { %v30_v9 = vpop.permute.xlu0 %29 }
  0x95   :  { %vm31_vm1 = vcmp.eq.s32.totalorder %v27_v8, %v30_v9 }
  0x96   :  { %v32_v11 = vsel %vm31_vm1, 0.91999996, %v92_v10 }
  0x97   :  { %v33_v14 = vmul.f32 %v32_v11, %v18_v5 }
  0x99   :  { %v34_v15 = vsel %vm14_vm0, %v33_v14, 0.0 }
  0x9e   :  { %v78_v12 = vpop.eup %77 }
  0x9f   :  { %v21_v13 = vsel %vm14_vm0, %v78_v12, 0.0 }
  0xa0   :  { %22 = vadd.xlane.f32.xlu1 %v21_v13 }
  0xa4   :  { %35 = vadd.xlane.f32.xlu1 %v34_v15 }
 0x129   :  { %v23_v16 = vpop.xlane.xlu1 %22 }
 0x12a   :  { %79 = vlog2.f32 %v23_v16 }
 0x12d   :  { %v36_v20 = vpop.xlane.xlu1 %35 }
 0x137   :  { %v80_v18 = vpop.eup %79 }
 0x138   :  { %v25_v19 = vmul.f32 0.6931472, %v80_v18 }
 0x13a   :  { %v37_v21 = vsub.f32 %v36_v20, %v25_v19 }
 0x13c   :  { %v44_v22 = vsel %vm43_vm2, %v37_v21, 0.0 }
 0x13d   :  { %v46_v23 = vsel %vm45_vm3, %v44_v22, 0.0 }
 0x13e   :  { %47 = vadd.xlane.f32.xlu1 %v46_v23 }
 0x1c7   :  { %v48_v24 = vpop.xlane.xlu1 %47 }
 0x1c8   :  { %v49_v25 = vrot.slane %v48_v24, 4 }
 0x1ca   :  { %v50_v26 = vadd.f32 %v49_v25, %v48_v24 }
 0x1cc   :  { %v51_v27 = vrot.slane %v50_v26, 2 }
 0x1ce   :  { %v52_v28 = vadd.f32 %v51_v27, %v50_v26 }
 0x1d0   :  { %v53_v29 = vrot.slane %v52_v28, 1 }
 0x1d2   :  { %v54_v30 = vadd.f32 %v53_v29, %v52_v28 }
 0x1d4   :  { %71 = vpush %v54_v30 }
 0x205   :  { %s72_s0 = spop %71 }
 0x206   :  { %57 = sst [smem:[#allocation2]] %s72_s0 }
 0x207   :  { %65 = dma.smem_to_hbm %s93_s1, 16, %s123_s2, [#allocation3]  }
 0x208   :  { %89 = dma.done.wait [#allocation3], 16  }
 0x209   :  { %90 = vsyncadd [#allocation3], 4294967280 }
 0x20a   :  { %69 = sfence }
 0x20b   :  { %70 = vsyncpa [#allocation3], 1 }

</bundles_post_ra>
